<compile_context>
chip_gen: v7x
topology: tpu7x:2x2x1
jax: 0.10.0
libtpu: 0.0.40
codegen_flags: <defaults>
</compile_context>

<pallas_src>
import jax
import jax.numpy as jnp
from jax.experimental import pallas as pl
from jax.experimental.pallas import tpu as pltpu

LANE = 128
OUT_COLS = 8  # lane-width of the output slab; only column 0 carries the real logit


def _round_up(n, m):
    return ((n + m - 1) // m) * m


def _choose_tb(B, Wp, block_b):
    """Batch-tile size: large when narrow (amortize ~0.35us/step), small when
    wide (cap TB*Wp f32 intermediates / vreg pressure); >=2 steps for megacore."""
    if Wp <= 512:
        tb = 1024
    elif Wp <= 1024:
        tb = 512
    elif Wp <= 2048:
        tb = 256
    else:
        tb = 128
    tb = min(tb, block_b)
    if B > 16:
        # guarantee at least 2 grid steps so the "parallel" batch axis can be
        # sharded across both v7x TensorCores
        tb = min(tb, _round_up(-(-B // 2), 16))
    tb = max(16, (tb // 16) * 16)
    if tb >= B:
        return B  # single block covering the whole (small) batch
    return tb


def mlp_kernel(x_ref, w1_ref, b1_ref, w2_ref, b2_ref, w3_ref, b3_ref, o_ref):
    # x_ref: (TB, W) f32 tile; w*_ref: bf16 resident weights; b1/b2: (1, Wp) f32
    # b3_ref: (1, 1) f32 scalar in SMEM; o_ref: (TB, OUT_COLS) f32.
    x = x_ref[...].astype(jnp.bfloat16)  # VPU cast, hides under MXU time
    h1 = jnp.dot(x, w1_ref[...], preferred_element_type=jnp.float32) + b1_ref[...]
    h1 = jnp.maximum(h1, 0.0).astype(jnp.bfloat16)
    h2 = jnp.dot(h1, w2_ref[...], preferred_element_type=jnp.float32) + b2_ref[...]
    h2 = jnp.maximum(h2, 0.0).astype(jnp.bfloat16)
    out = jnp.dot(h2, w3_ref[...], preferred_element_type=jnp.float32)
    o_ref[...] = out + b3_ref[0, 0]


def pack_params(params):
    """One-time packing of PyTorch-style params into lane-dense bf16 slabs.

    Padded hidden columns stay exactly 0 through bias(0)+ReLU and the padded
    w2/w3 rows are 0, so padding never perturbs the real output column.
    """
    w1, b1, w2, b2, w3, b3 = params
    W = w1.shape[0]
    Wp = _round_up(W, LANE)
    bf16 = jnp.bfloat16
    w1p = jnp.zeros((W, Wp), bf16).at[:, :W].set(w1.astype(bf16))
    w2p = jnp.zeros((Wp, Wp), bf16).at[:W, :W].set(w2.astype(bf16))
    w3p = jnp.zeros((Wp, OUT_COLS), bf16).at[:W, :1].set(w3.astype(bf16))
    b1p = jnp.zeros((1, Wp), jnp.float32).at[:, :W].set(
        b1.astype(jnp.float32).reshape(1, W))
    b2p = jnp.zeros((1, Wp), jnp.float32).at[:, :W].set(
        b2.astype(jnp.float32).reshape(1, W))
    b3s = b3.astype(jnp.float32).reshape(1, 1)
    return (w1p, b1p, w2p, b2p, w3p, b3s)


def neural_network_forward(x, packed, *, block_b=1024):
    """Pallas forward: Linear(w,w)->ReLU->Linear(w,w)->ReLU->Linear(w,1)."""
    w1p, b1p, w2p, b2p, w3p, b3s = packed
    B, F = x.shape
    W, Wp = w1p.shape
    assert F == W, "feature width must match first Linear fan-in"

    TB = _choose_tb(B, Wp, block_b)
    grid = (pl.cdiv(B, TB),)  # partial edge block handled (masked) by Pallas

    # --- VMEM budget: single-buffered weights + double-buffered x/out +
    #     in-flight TB x Wp intermediates (f32 h1/h2 + bf16 casts) ---
    weight_bytes = (w1p.size + w2p.size + w3p.size) * 2 + (b1p.size + b2p.size) * 4
    io_bytes = 2 * TB * W * 4 + 2 * TB * OUT_COLS * 4
    interm_bytes = TB * Wp * 14
    need = weight_bytes + io_bytes + interm_bytes
    try:
        phys_vmem = int(pltpu.get_tpu_info().vmem_capacity_bytes)
    except Exception:  # pragma: no cover - conservative (v7x-sized) fallback
        phys_vmem = 64 << 20
    vmem_limit = int(min(max(int(need * 1.25) + (2 << 20), 32 << 20),
                         min(100 << 20, int(phys_vmem * 0.85))))

    flops = 2 * B * (W * Wp + Wp * Wp + Wp * OUT_COLS)
    bytes_accessed = int(B * W * 4 + weight_bytes + 4 + B * OUT_COLS * 4)

    def wspec(shape):
        # resident (constant index_map), single-buffered weight/bias block
        return pl.BlockSpec(shape, lambda i: (0, 0), pipeline_mode=pl.Buffered(1))

    out_padded = pl.pallas_call(
        mlp_kernel,
        out_shape=jax.ShapeDtypeStruct((B, OUT_COLS), jnp.float32),
        grid_spec=pltpu.PrefetchScalarGridSpec(
            num_scalar_prefetch=0,
            grid=grid,
            in_specs=[
                pl.BlockSpec((TB, W), lambda i: (i, 0)),             # x (pipelined)
                wspec((W, Wp)),                                      # w1 (resident)
                wspec((1, Wp)),                                      # b1
                wspec((Wp, Wp)),                                     # w2
                wspec((1, Wp)),                                      # b2
                wspec((Wp, OUT_COLS)),                               # w3 (col 0 real)
                pl.BlockSpec(memory_space=pltpu.MemorySpace.SMEM),   # b3 scalar
            ],
            out_specs=pl.BlockSpec((TB, OUT_COLS), lambda i: (i, 0)),
        ),
        compiler_params=pltpu.CompilerParams(
            dimension_semantics=("parallel",),   # megacore sharding on v7x
            vmem_limit_bytes=vmem_limit,
        ),
        cost_estimate=pl.CostEstimate(
            flops=flops, transcendentals=0, bytes_accessed=bytes_accessed
        ),
    )(x, w1p, b1p, w2p, b2p, w3p, b3s)

    # Real logit lives in column 0 of the 8-lane output slab.
    return out_padded[:, :1]


def init_params(key, w):
    """Deterministic init mimicking PyTorch nn.Linear defaults (uniform +/- 1/sqrt(fan_in)).

    Weights are stored pre-transposed as (in_features, out_features), so the
    forward computes y = x @ W + b, matching nn.Linear's x @ W_pt.T + b.
    """
    ks = jax.random.split(key, 6)
    bound1 = 1.0 / jnp.sqrt(w)
    w1 = jax.random.uniform(ks[0], (w, w), jnp.float32, -bound1, bound1)
    b1 = jax.random.uniform(ks[1], (1, w), jnp.float32, -bound1, bound1)
    w2 = jax.random.uniform(ks[2], (w, w), jnp.float32, -bound1, bound1)
    b2 = jax.random.uniform(ks[3], (1, w), jnp.float32, -bound1, bound1)
    w3 = jax.random.uniform(ks[4], (w, 1), jnp.float32, -bound1, bound1)
    b3 = jax.random.uniform(ks[5], (1, 1), jnp.float32, -bound1, bound1)
    return (w1, b1, w2, b2, w3, b3)


def reference_forward(x, params):
    w1, b1, w2, b2, w3, b3 = params
    h1 = jnp.maximum(x @ w1 + b1, 0.0)
    h2 = jnp.maximum(h1 @ w2 + b2, 0.0)
    return h2 @ w3 + b3


if __name__ == "__main__":
    key = jax.random.PRNGKey(0)
    k_x, k_p = jax.random.split(key)

    # Demo size: batch=8 rows, feat=32 CSV feature columns (w of the module).
    # At this size the kernel is launch-latency bound; the structure (gridded
    # batch, resident single-buffered weights, lane-dense hidden width,
    # narrow output slab) is what scales to large batches / widths.
    batch, feat = 8, 32
    x = jax.random.normal(k_x, (batch, feat), dtype=jnp.float32)
    params = init_params(k_p, feat)

    packed = pack_params(params)                 # one-time weight packing
    packed = jax.tree_util.tree_map(jax.block_until_ready, packed)

    fwd = jax.jit(neural_network_forward)
    out = jax.block_until_ready(fwd(x, packed))

    ref = reference_forward(x, params)
    assert out.shape == (batch, 1)
    # bf16 matmul operands (f32 accumulation) -> loosened tolerance vs pure f32.
    assert jnp.allclose(out, ref, atol=3e-2, rtol=3e-2), (
        f"max abs err {float(jnp.max(jnp.abs(out - ref)))}"
    )

    print("KERNEL_OK")
</pallas_src>

<mosaic_0001>
module attributes {stable_mosaic.version = 11 : i64} {
  func.func @mlp_kernel(%arg0: i32, %arg1: memref<8x32xf32, #tpu.memory_space<vmem>>, %arg2: memref<32x128xbf16, #tpu.memory_space<vmem>>, %arg3: memref<1x128xf32, #tpu.memory_space<vmem>>, %arg4: memref<128x128xbf16, #tpu.memory_space<vmem>>, %arg5: memref<1x128xf32, #tpu.memory_space<vmem>>, %arg6: memref<128x8xbf16, #tpu.memory_space<vmem>>, %arg7: memref<1x1xf32, #tpu.memory_space<smem>>, %arg8: memref<8x8xf32, #tpu.memory_space<vmem>>) attributes {dimension_semantics = [#tpu.dimension_semantics<parallel>], iteration_bounds = array<i64: 1>, scalar_prefetch = 0 : i64, scratch_operands = 0 : i64, tpu.core_type = #tpu.core_type<tc>, window_params = [{transform_indices = @transform_0, window_bounds = array<i64: 8, 32>}, {pipeline_mode = #tpu.pipeline_mode<synchronous>, transform_indices = @transform_1, window_bounds = array<i64: 32, 128>}, {pipeline_mode = #tpu.pipeline_mode<synchronous>, transform_indices = @transform_2, window_bounds = array<i64: 1, 128>}, {pipeline_mode = #tpu.pipeline_mode<synchronous>, transform_indices = @transform_3, window_bounds = array<i64: 128, 128>}, {pipeline_mode = #tpu.pipeline_mode<synchronous>, transform_indices = @transform_4, window_bounds = array<i64: 1, 128>}, {pipeline_mode = #tpu.pipeline_mode<synchronous>, transform_indices = @transform_5, window_bounds = array<i64: 128, 8>}, {transform_indices = @transform_6, window_bounds = array<i64: 1, 1>}, {transform_indices = @transform_7, window_bounds = array<i64: 8, 8>}]} {
    %c0 = arith.constant 0 : index
    %c0_0 = arith.constant 0 : index
    %0 = vector.load %arg1[%c0, %c0_0] : memref<8x32xf32, #tpu.memory_space<vmem>>, vector<8x32xf32>
    %1 = arith.truncf %0 : vector<8x32xf32> to vector<8x32xbf16>
    %c0_1 = arith.constant 0 : index
    %c0_2 = arith.constant 0 : index
    %2 = vector.load %arg2[%c0_1, %c0_2] : memref<32x128xbf16, #tpu.memory_space<vmem>>, vector<32x128xbf16>
    %cst = arith.constant dense<0.000000e+00> : vector<8x128xf32>
    %3 = tpu.matmul %1, %2, %cst {dimension_numbers = #tpu.dot_dimension_numbers<[1], [0], [0], [1], [0, 0, 1, 1], [], []>} : vector<8x32xbf16>, vector<32x128xbf16>, vector<8x128xf32> -> vector<8x128xf32>
    %c0_3 = arith.constant 0 : index
    %c0_4 = arith.constant 0 : index
    %4 = vector.load %arg3[%c0_3, %c0_4] : memref<1x128xf32, #tpu.memory_space<vmem>>, vector<1x128xf32>
    %5 = vector.broadcast %4 : vector<1x128xf32> to vector<8x128xf32>
    %6 = arith.addf %3, %5 : vector<8x128xf32>
    %cst_5 = arith.constant 0.000000e+00 : f32
    %7 = vector.broadcast %cst_5 : f32 to vector<8x128xf32>
    %8 = arith.maximumf %6, %7 : vector<8x128xf32>
    %9 = arith.truncf %8 : vector<8x128xf32> to vector<8x128xbf16>
    %c0_6 = arith.constant 0 : index
    %c0_7 = arith.constant 0 : index
    %10 = vector.load %arg4[%c0_6, %c0_7] : memref<128x128xbf16, #tpu.memory_space<vmem>>, vector<128x128xbf16>
    %cst_8 = arith.constant dense<0.000000e+00> : vector<8x128xf32>
    %11 = tpu.matmul %9, %10, %cst_8 {dimension_numbers = #tpu.dot_dimension_numbers<[1], [0], [0], [1], [0, 0, 1, 1], [], []>} : vector<8x128xbf16>, vector<128x128xbf16>, vector<8x128xf32> -> vector<8x128xf32>
    %c0_9 = arith.constant 0 : index
    %c0_10 = arith.constant 0 : index
    %12 = vector.load %arg5[%c0_9, %c0_10] : memref<1x128xf32, #tpu.memory_space<vmem>>, vector<1x128xf32>
    %13 = vector.broadcast %12 : vector<1x128xf32> to vector<8x128xf32>
    %14 = arith.addf %11, %13 : vector<8x128xf32>
    %cst_11 = arith.constant 0.000000e+00 : f32
    %15 = vector.broadcast %cst_11 : f32 to vector<8x128xf32>
    %16 = arith.maximumf %14, %15 : vector<8x128xf32>
    %17 = arith.truncf %16 : vector<8x128xf32> to vector<8x128xbf16>
    %c0_12 = arith.constant 0 : index
    %c0_13 = arith.constant 0 : index
    %18 = vector.load %arg6[%c0_12, %c0_13] : memref<128x8xbf16, #tpu.memory_space<vmem>>, vector<128x8xbf16>
    %cst_14 = arith.constant dense<0.000000e+00> : vector<8x8xf32>
    %19 = tpu.matmul %17, %18, %cst_14 {dimension_numbers = #tpu.dot_dimension_numbers<[1], [0], [0], [1], [0, 0, 1, 1], [], []>} : vector<8x128xbf16>, vector<128x8xbf16>, vector<8x8xf32> -> vector<8x8xf32>
    %c0_15 = arith.constant 0 : index
    %c0_16 = arith.constant 0 : index
    %20 = memref.load %arg7[%c0_15, %c0_16] : memref<1x1xf32, #tpu.memory_space<smem>>
    %21 = vector.broadcast %20 : f32 to vector<8x8xf32>
    %22 = arith.addf %19, %21 : vector<8x8xf32>
    %c0_17 = arith.constant 0 : index
    %c0_18 = arith.constant 0 : index
    %23 = vector.load %arg8[%c0_17, %c0_18] : memref<8x8xf32, #tpu.memory_space<vmem>>, vector<8x8xf32>
    tpu.vector_store %arg8[%c0_17, %c0_18], %22 {strides = array<i32>} : memref<8x8xf32, #tpu.memory_space<vmem>>, vector<8x8xf32>,
    return
  }
  func.func @transform_0(%arg0: i32) -> (i32, i32) {
    %c0_i32 = arith.constant 0 : i32
    %c0_i32_0 = arith.constant 0 : i32
    return %arg0, %c0_i32 : i32, i32
  }
  func.func @transform_1(%arg0: i32) -> (i32, i32) {
    %c0_i32 = arith.constant 0 : i32
    %c0_i32_0 = arith.constant 0 : i32
    %c0_i32_1 = arith.constant 0 : i32
    return %c0_i32, %c0_i32_0 : i32, i32
  }
  func.func @transform_2(%arg0: i32) -> (i32, i32) {
    %c0_i32 = arith.constant 0 : i32
    %c0_i32_0 = arith.constant 0 : i32
    %c0_i32_1 = arith.constant 0 : i32
    return %c0_i32, %c0_i32_0 : i32, i32
  }
  func.func @transform_3(%arg0: i32) -> (i32, i32) {
    %c0_i32 = arith.constant 0 : i32
    %c0_i32_0 = arith.constant 0 : i32
    %c0_i32_1 = arith.constant 0 : i32
    return %c0_i32, %c0_i32_0 : i32, i32
  }
  func.func @transform_4(%arg0: i32) -> (i32, i32) {
    %c0_i32 = arith.constant 0 : i32
    %c0_i32_0 = arith.constant 0 : i32
    %c0_i32_1 = arith.constant 0 : i32
    return %c0_i32, %c0_i32_0 : i32, i32
  }
  func.func @transform_5(%arg0: i32) -> (i32, i32) {
    %c0_i32 = arith.constant 0 : i32
    %c0_i32_0 = arith.constant 0 : i32
    %c0_i32_1 = arith.constant 0 : i32
    return %c0_i32, %c0_i32_0 : i32, i32
  }
  func.func @transform_6(%arg0: i32) -> (i32, i32) {
    %c0_i32 = arith.constant 0 : i32
    %c0_i32_0 = arith.constant 0 : i32
    %c0_i32_1 = arith.constant 0 : i32
    return %c0_i32, %c0_i32_0 : i32, i32
  }
  func.func @transform_7(%arg0: i32) -> (i32, i32) {
    %c0_i32 = arith.constant 0 : i32
    %c0_i32_0 = arith.constant 0 : i32
    return %arg0, %c0_i32 : i32, i32
  }
}

</mosaic_0001>

<bundles_post_ra>
// kernel: neural_network_forward.1
= control target key start
LH: loop header
LB: loop body
LE: loop exit
PB: predicated region body
PF: predicated region fallthrough
CT: control target
= control target key end

     0   :  { %13 = vsyncpa [#allocation4], 0  ;;  %s472_s24 = smov [#allocation3]   ;;  %s617_s0 = inlined_call_operand.hbm [shape: f32[8,32], index: 0, kind: input, shape index: {}]   ;;  %s618_s1 = inlined_call_operand.vmem [shape: bf16[32,128], index: 1, kind: input, shape index: {}]   ;;  %s619_s2 = inlined_call_operand.vmem [shape: f32[1,128], index: 2, kind: input, shape index: {}]   ;;  %s620_s3 = inlined_call_operand.vmem [shape: bf16[128,128], index: 3, kind: input, shape index: {}]   ;;  %s621_s4 = inlined_call_operand.vmem [shape: f32[1,128], index: 4, kind: input, shape index: {}]   ;;  %s622_s5 = inlined_call_operand.vmem [shape: bf16[128,8], index: 5, kind: input, shape index: {}]   ;;  %s623_s6 = inlined_call_operand.<no memory space> [shape: f32[1,1], index: 6, kind: input, shape index: {}]   ;;  %s624_s7 = inlined_call_operand.vmem [shape: f32[8,8], index: 7, kind: output, shape index: {}]  }
   0x1   :  { %s20_s25 = sshll.u32 %s472_s24, 4  ;;  %s448_s28 = scalar_lea.hbm %s617_s0, 128  ;;  %s21_s25 = int_to_ptr.vmem [resolvable:$true] %s20_s25 }
   0x2   :  { %p449_p0 = scmp.ne.s32.totalorder %s617_s0, %s448_s28  ;;  %p452_p1 = scmp.lt.u32.totalorder %s448_s28, %s617_s0 }
   0x4   :  { %p454_p2 = pnand %p452_p1, %p449_p0 }
   0x6   :  { %457 = shalt.err (!%p454_p2)
}
   0x7   :  { %s458_s10 = scalar_lea.vmem %s21_s25, 128  ;;  %p463_p4 = scmp.lt.s32.totalorder %s21_s25, %s21_s25 }
   0x8   :  { %p459_p3 = scmp.ne.s32.totalorder %s21_s25, %s458_s10  ;;  %p464_p5 = scmp.lt.s32.totalorder %s458_s10, %s458_s10 }
   0xa   :  { %p465_p6 = por %p464_p5, %p463_p4 }
   0xc   :  { %p466_p7 = pnand %p465_p6, %p459_p3 }
   0xe   :  { %469 = shalt.err (!%p466_p7)
}
   0xf   :  { %23 = dma.hbm_to_vmem [thread:$0]  %s617_s0, 128, %s21_s25, [#allocation4]  }
  0x10   :  { %470 = dma.done.wait [#allocation4], 128  }
  0x11   :  { %471 = vsyncadd [#allocation4], 4294967168  ;;  %v473_v0 = vmov 0.0   ;;  %vm474_vm0 = vmmov 0   ;;  %v430_v1 = vld [vmem:[%s618_s1] sm:$0xff]   ;;  %v431_v2 = vld [vmem:[%s618_s1 + $0x8] sm:$0xff]   ;;  %v241_v37 = vstv %s623_s6 }
  0x12   :  { %379 = vmatprep.subr.bf16.mxu0 %v473_v0  ;;  %383 = vmatprep.mubr.msk.bf16.mxu0 %vm474_vm0, %v473_v0  ;;  %v40_v3 = vld [vmem:[#allocation3] sm:$0xff]  ;;  %v433_v6 = vld [vmem:[%s620_s3 + $0x8] sm:$0xff]   ;;  %vm65_vm1 = vcmask 261120   ;;  %v434_v7 = vld [vmem:[%s620_s3 + $0x10] sm:$0xff]   ;;  %vm330_vm2 = vcmask 64512  }
  0x13   :  { %387 = vmatprep.subr.bf16.mxu1 %v473_v0  ;;  %403 = vmatprep.mubr.msk.bf16.mxu1 %vm474_vm0, %v473_v0  ;;  %v432_v4 = vld [vmem:[%s620_s3] sm:$0xff]   ;;  %v41_v5 = vpack.c.bf16 %v40_v3, %v40_v3  ;;  %v435_v8 = vld [vmem:[%s620_s3 + $0x18] sm:$0xff]   ;;  %v437_v10 = vld [vmem:[%s620_s3 + $0x28] sm:$0xff]  }
  0x14   :  { %380 = vmatpush3.bf16.msra.mxu0 %v430_v1  ;;  %388 = vmatpush3.bf16.msra.mxu1 %v432_v4  ;;  %v436_v9 = vld [vmem:[%s620_s3 + $0x20] sm:$0xff]   ;;  %v438_v11 = vld [vmem:[%s620_s3 + $0x30] sm:$0xff]   ;;  %v439_v12 = vld [vmem:[%s620_s3 + $0x38] sm:$0xff]  }
  0x15   :  { %381 = vmatprep.subr.bf16.mxu0 %v473_v0  ;;  %389 = vmatprep.subr.bf16.mxu1 %v473_v0  ;;  %v440_v13 = vld [vmem:[%s622_s5] sm:$0xff]   ;;  %v441_v14 = vld [vmem:[%s622_s5 + $0x8] sm:$0xff]   ;;  %v442_v15 = vld [vmem:[%s622_s5 + $0x10] sm:$0xff]  }
  0x16   :  { %v443_v16 = vld [vmem:[%s622_s5 + $0x18] sm:$0xff]   ;;  %v444_v17 = vld [vmem:[%s622_s5 + $0x20] sm:$0xff]   ;;  %v445_v18 = vld [vmem:[%s622_s5 + $0x28] sm:$0xff]  }
  0x17   :  { %v337_v19 = vld [vmem:[%s619_s2] ss:$0 sm:$0xff]  ;;  %v446_v27 = vld [vmem:[%s622_s5 + $0x30] sm:$0xff]   ;;  %v447_v28 = vld [vmem:[%s622_s5 + $0x38] sm:$0xff]  }
  0x18   :  { %382 = vmatpush3.bf16.msra.mxu0 %v431_v2  ;;  %390 = vmatpush3.bf16.msra.mxu1 %v433_v6  ;;  %v341_v29 = vld [vmem:[%s621_s4] ss:$0 sm:$0xff] }
  0x19   :  { %407 = vmatprep.subr.bf16.mxu0 %v473_v0  ;;  %391 = vmatprep.subr.bf16.mxu1 %v473_v0 }
  0x1b   :  { %384 = vmatmul.mubr.msk.bf16.vlgmr.msra.gmra.mrb[0].mxu0 %vm65_vm1, %v41_v5 }
  0x1c   :  { %423 = vmatprep.mubr.msk.bf16.mxu0 %vm474_vm0, %v473_v0  ;;  %392 = vmatpush3.bf16.msra.mxu1 %v434_v7 }
  0x1d   :  { %393 = vmatprep.subr.bf16.mxu1 %v473_v0  ;;  %408 = vmatpush3.bf16.msra.mxu0 %v440_v13 }
  0x1e   :  { %409 = vmatprep.subr.bf16.mxu0 %v473_v0 }
  0x20   :  { %394 = vmatpush3.bf16.msra.mxu1 %v435_v8 }
  0x21   :  { %395 = vmatprep.subr.bf16.mxu1 %v473_v0  ;;  %410 = vmatpush3.bf16.msra.mxu0 %v441_v14 }
  0x22   :  { %411 = vmatprep.subr.bf16.mxu0 %v473_v0 }
  0x24   :  { %396 = vmatpush3.bf16.msra.mxu1 %v436_v9 }
  0x25   :  { %397 = vmatprep.subr.bf16.mxu1 %v473_v0  ;;  %412 = vmatpush3.bf16.msra.mxu0 %v442_v15 }
  0x26   :  { %413 = vmatprep.subr.bf16.mxu0 %v473_v0 }
  0x28   :  { %398 = vmatpush3.bf16.msra.mxu1 %v437_v10 }
  0x29   :  { %399 = vmatprep.subr.bf16.mxu1 %v473_v0  ;;  %414 = vmatpush3.bf16.msra.mxu0 %v443_v16 }
  0x2a   :  { %415 = vmatprep.subr.bf16.mxu0 %v473_v0 }
  0x2c   :  { %400 = vmatpush3.bf16.msra.mxu1 %v438_v11 }
  0x2d   :  { %401 = vmatprep.subr.bf16.mxu1 %v473_v0  ;;  %416 = vmatpush3.bf16.msra.mxu0 %v444_v17 }
  0x2e   :  { %417 = vmatprep.subr.bf16.mxu0 %v473_v0 }
  0x30   :  { %402 = vmatpush3.bf16.msra.mxu1 %v439_v12 }
  0x31   :  { %418 = vmatpush3.bf16.msra.mxu0 %v445_v18 }
  0x32   :  { %419 = vmatprep.subr.bf16.mxu0 %v473_v0 }
  0x35   :  { %420 = vmatpush3.bf16.msra.mxu0 %v446_v27 }
  0x36   :  { %421 = vmatprep.subr.bf16.mxu0 %v473_v0 }
  0x39   :  { %422 = vmatpush3.bf16.msra.mxu0 %v447_v28 }
  0xee   :  { %v103_v20 = vpop.f32.mrb[0].mxu0 }
  0xef   :  { %v104_v21 = vadd.f32 %v337_v19, %v103_v20  ;;  %v385_v22 = vpop.f32.mrb[1].mxu0 }
  0xf0   :  { %v106_v23 = vpop.f32.mrb[2].mxu0 }
  0xf1   :  { %v109_v24 = vmax.f32 %v104_v21, 0.0  ;;  %v386_v25 = vpop.f32.mrb[3].mxu0 }
  0xf3   :  { %v110_v26 = vpack.c.bf16 %v109_v24, %v109_v24 }
  0xf5   :  { %404 = vmatmul.mubr.bf16.vlgmr.msra.gmra.mrb[0].mxu1 %v110_v26 }
 0x1c8   :  { %v216_v30 = vpop.f32.mrb[0].mxu1 }
 0x1c9   :  { %v217_v31 = vadd.f32 %v341_v29, %v216_v30  ;;  %v405_v32 = vpop.f32.mrb[1].mxu1 }
 0x1ca   :  { %v219_v33 = vpop.f32.mrb[2].mxu1 }
 0x1cb   :  { %v222_v34 = vmax.f32 %v217_v31, 0.0  ;;  %v406_v35 = vpop.f32.mrb[3].mxu1 }
 0x1cd   :  { %v223_v36 = vpack.c.bf16 %v222_v34, %v222_v34 }
 0x1cf   :  { %424 = vmatmul.mubr.bf16.vlgmr.msra.gmra.mrb[4].mxu0 %v223_v36 }
 0x2a2   :  { %v324_v38 = vpop.f32.mrb[4].mxu0 }
 0x2a3   :  { %v325_v39 = vadd.f32 %v324_v38, %v241_v37  ;;  %v425_v40 = vpop.f32.mrb[5].mxu0 }
 0x2a4   :  { %v327_v41 = vpop.f32.mrb[6].mxu0 }
 0x2a5   :  { %331 = vst.msk [vmem:[%s624_s7] sm:$0xff] %vm330_vm2, %v325_v39  ;;  %v426_v42 = vpop.f32.mrb[7].mxu0 }
 0x2a6   :  { %336 = vsyncpa [#allocation4], 1 }

</bundles_post_ra>
